<compile_context>
chip_gen: v5e
topology: v5e:2x2
jax: 0.10.0
libtpu: 0.0.40
codegen_flags: <defaults>
</compile_context>

<pallas_src>
import functools
from typing import Optional, Sequence

import jax
import jax.numpy as jnp
from jax import lax
from jax.experimental import pallas as pl
from jax.experimental.pallas import tpu as pltpu

# Effectively -inf bias for padded species columns: exp(logit - max) underflows to
# exactly 0, so neither the softmax denominator nor the per-genus sums are perturbed.
_NEG_LARGE = -1e30


def _round_up(v: int, m: int) -> int:
    return (v + m - 1) // m * m


def _resident_spec(block_shape):
    """BlockSpec for a block whose index never changes across the grid: request a
    single pipeline buffer so it is held once in VMEM instead of twice."""
    index_map = lambda i: (0, 0)
    try:
        return pl.BlockSpec(block_shape, index_map, pipeline_mode=pl.Buffered(1))
    except (AttributeError, TypeError):
        # Older JAX without pipeline_mode / Buffered: fall back to default buffering.
        return pl.BlockSpec(block_shape, index_map)


def _head_kernel(x_ref, w_ref, b_ref, g_ref, genus_ref, species_ref, *,
                 output_logits: bool, num_genus: int, g_pad: int):
    # x: [TB, F], w: [F, S_pad] (pre-transposed), b: [1, S_pad] f32,
    # g: [S_pad, G_pad] 0/1 group-membership matrix (bf16 on the fast path).

    # Linear layer on the MXU, f32 accumulation.
    species_logits = jnp.dot(x_ref[...], w_ref[...],
                             preferred_element_type=jnp.float32) + b_ref[...]

    # Numerically stable softmax over the species axis (f32 on VPU/EUP).
    m = jnp.max(species_logits, axis=-1, keepdims=True)
    e = jnp.exp(species_logits - m)                      # padded cols -> exactly 0
    denom = jnp.sum(e, axis=-1, keepdims=True)

    # Per-genus sums of unnormalized probabilities via the group matrix (MXU).
    # Group dtype drives the MXU path: bf16 group (exact 0/1) + bf16 `e` on the
    # fast path; f32 on the exact path.
    genus_e = jnp.dot(e.astype(g_ref.dtype), g_ref[...],
                      preferred_element_type=jnp.float32)

    if output_logits:
        if g_pad > num_genus:
            # Padded genus columns have genus_e == 0 -> log would store -inf.
            # Replace with 1.0 (finite output); real columns untouched, padding is
            # sliced off by the wrapper anyway.
            col = lax.broadcasted_iota(jnp.int32, (1, g_pad), 1)
            genus_e = jnp.where(col < num_genus, genus_e, 1.0)
        # log(genus_probs) = log(sum_genus e) - log(sum_all e): reuses e, robust.
        genus_ref[...] = (jnp.log(genus_e) - jnp.log(denom)).astype(genus_ref.dtype)
        species_ref[...] = species_logits.astype(species_ref.dtype)
    else:
        inv_denom = pl.reciprocal(denom, approx=False)   # EUP slot, frees the VALU
        genus_ref[...] = (genus_e * inv_denom).astype(genus_ref.dtype)
        species_ref[...] = (e * inv_denom).astype(species_ref.dtype)


def _vmem_capacity_bytes() -> int:
    try:
        cap = getattr(pltpu.get_tpu_info(), "vmem_capacity_bytes", None)
        if cap:
            return int(cap)
    except Exception:
        pass
    return 64 << 20  # conservative default (v7x per-TensorCore VMEM)


def _vmem_budgets() -> tuple:
    """(tile-chooser budget, vmem_limit cap), generation-aware."""
    cap = _vmem_capacity_bytes()
    if cap >= (96 << 20):           # v5e / v6e: 128 MiB physical VMEM
        return 88 << 20, 104 << 20
    return 40 << 20, 52 << 20       # v7x: 64 MiB physical; keep scratch headroom


def _footprints(tb, F, S_pad, G_pad, x_isz, w_isz, g_isz, out_isz):
    # Resident (single-buffered) params: W^T, bias, group matrix.
    fixed = F * S_pad * w_isz + S_pad * 4 + S_pad * G_pad * g_isz
    per_step = (2 * tb * F * x_isz                      # x tile, double-buffered
                + 2 * tb * (S_pad + G_pad) * out_isz    # output tiles, double-buffered
                + 4 * tb * S_pad * 4)                   # f32 logits / e / probs temps
    return fixed, per_step


def _choose_batch_tile(B, F, S_pad, G_pad, x_isz, w_isz, g_isz, out_isz,
                       budget_bytes, sublane):
    """Largest batch tile (multiple of `sublane`, <= 512) whose VMEM footprint fits."""
    tb = min(_round_up(B, sublane), 512)
    while tb > sublane:
        fixed, per_step = _footprints(tb, F, S_pad, G_pad, x_isz, w_isz, g_isz, out_isz)
        if fixed + per_step <= budget_bytes:
            return tb
        tb -= sublane
    fixed, per_step = _footprints(tb, F, S_pad, G_pad, x_isz, w_isz, g_isz, out_isz)
    if fixed + per_step > budget_bytes:
        # TODO(synk): S-tiled online-softmax variant for very large species counts.
        raise ValueError(
            f"Species axis too large for the single-pass head kernel: needs "
            f"~{(fixed + per_step) >> 20} MiB VMEM > budget {budget_bytes >> 20} MiB.")
    return tb


def hierarchical_prediction_head(x, weight, bias,
                                 num_species_each_genus: Sequence[int],
                                 output_types: str = "probs",
                                 matmul_dtype: Optional[jnp.dtype] = jnp.bfloat16,
                                 out_dtype: Optional[jnp.dtype] = None,
                                 return_padded: bool = False):
    """x: [B, F]; weight: [S, F] (torch Linear layout); bias: [S].

    Returns (genus_out [B, G], species_out [B, S]).
    matmul_dtype=jnp.bfloat16 (default) is the native-MXU fast path (f32 accumulate);
    pass jnp.float32 for an exact-f32 path. out_dtype defaults to x's dtype.
    """
    B, F = x.shape
    S, F_w = weight.shape
    assert F_w == F
    num_species_each_genus = list(num_species_each_genus)
    G = len(num_species_each_genus)
    assert sum(num_species_each_genus) == S

    out_dt = jnp.dtype(out_dtype) if out_dtype is not None else jnp.dtype(x.dtype)

    # Lane-dense 128 padding of the species / genus axes (unmasked vst stores).
    S_pad = _round_up(S, 128)
    G_pad = _round_up(G, 128)

    # Pre-transpose the Linear weight ONCE in XLA: [S, F] -> [F, S]; no in-kernel .T.
    w_t = weight.T
    x_mm = x
    if matmul_dtype is not None:
        x_mm = x.astype(matmul_dtype)
        w_t = w_t.astype(matmul_dtype)
    mm_dt = jnp.dtype(x_mm.dtype)
    group_dtype = jnp.bfloat16 if mm_dt == jnp.bfloat16 else jnp.float32

    x_isz = mm_dt.itemsize
    w_isz = jnp.dtype(w_t.dtype).itemsize
    g_isz = jnp.dtype(group_dtype).itemsize
    out_isz = out_dt.itemsize
    sublane = {1: 32, 2: 16}.get(x_isz, 8)

    budget, limit_cap = _vmem_budgets()
    TB = _choose_batch_tile(B, F, S_pad, G_pad, x_isz, w_isz, g_isz, out_isz,
                            budget, sublane)
    B_pad = _round_up(B, TB)
    # v7x has 2 TensorCores: with a 'parallel' batch axis, make sure there are at
    # least 2 grid steps when the batch is big enough to split.
    if B_pad // TB < 2 and B >= 2 * sublane:
        TB = _round_up(-(-B // 2), sublane)
        B_pad = _round_up(B, TB)
    num_steps = B_pad // TB

    # Padded operands (built once in XLA; skipped when no padding is needed).
    x_p = x_mm if B_pad == B else jnp.zeros((B_pad, F), x_mm.dtype).at[:B, :].set(x_mm)
    w_p = w_t if S_pad == S else jnp.zeros((F, S_pad), w_t.dtype).at[:, :S].set(w_t)
    b_p = jnp.full((1, S_pad), _NEG_LARGE, jnp.float32).at[0, :S].set(
        bias.astype(jnp.float32))

    genus_ids = jnp.concatenate([
        jnp.full((n,), g, dtype=jnp.int32)
        for g, n in enumerate(num_species_each_genus)])
    group = jax.nn.one_hot(genus_ids, G_pad, dtype=group_dtype)          # [S, G_pad]
    group_p = (group if S_pad == S
               else jnp.zeros((S_pad, G_pad), group_dtype).at[:S, :].set(group))

    kernel = functools.partial(_head_kernel,
                               output_logits=(output_types == "logits"),
                               num_genus=G, g_pad=G_pad)

    out_shapes = (jax.ShapeDtypeStruct((B_pad, G_pad), out_dt),
                  jax.ShapeDtypeStruct((B_pad, S_pad), out_dt))

    bytes_accessed = (x_p.size * x_isz + w_p.size * w_isz + b_p.size * 4
                      + group_p.size * g_isz + B_pad * (G_pad + S_pad) * out_isz)
    cost = pl.CostEstimate(
        flops=2 * B_pad * F * S_pad + 2 * B_pad * S_pad * G_pad,
        transcendentals=2 * B_pad * S_pad,
        bytes_accessed=bytes_accessed)

    fixed_vmem, per_step_vmem = _footprints(TB, F, S_pad, G_pad,
                                            x_isz, w_isz, g_isz, out_isz)
    vmem_limit = min(limit_cap,
                     max(32 << 20,
                         int((fixed_vmem + per_step_vmem) * 1.25) + (4 << 20)))

    genus_out, species_out = pl.pallas_call(
        kernel,
        out_shape=out_shapes,
        grid_spec=pltpu.PrefetchScalarGridSpec(
            num_scalar_prefetch=0,
            grid=(num_steps,),
            in_specs=[
                pl.BlockSpec((TB, F), lambda i: (i, 0)),   # x: tiled along batch
                _resident_spec((F, S_pad)),                # W^T: resident, 1 buffer
                _resident_spec((1, S_pad)),                # bias: resident, 1 buffer
                _resident_spec((S_pad, G_pad)),            # group: resident, 1 buffer
            ],
            out_specs=[
                pl.BlockSpec((TB, G_pad), lambda i: (i, 0)),
                pl.BlockSpec((TB, S_pad), lambda i: (i, 0)),
            ],
        ),
        compiler_params=pltpu.CompilerParams(
            dimension_semantics=("parallel",),
            vmem_limit_bytes=vmem_limit,
        ),
        cost_estimate=cost,
    )(x_p, w_p, b_p, group_p)

    if return_padded:
        return genus_out, species_out
    return genus_out[:B, :G], species_out[:B, :S]


def _reference(x, weight, bias, num_species_each_genus, output_types="probs"):
    species_logits = (x.astype(jnp.float32) @ weight.T.astype(jnp.float32)
                      + bias.astype(jnp.float32))
    species_probs = jax.nn.softmax(species_logits, axis=1)
    sums, off = [], 0
    for n in num_species_each_genus:
        sums.append(jnp.sum(species_probs[:, off:off + n], axis=1, keepdims=True))
        off += n
    genus_probs = jnp.concatenate(sums, axis=1)
    if output_types == "logits":
        return jnp.log(genus_probs), species_logits
    return genus_probs, species_probs


if __name__ == "__main__":
    key = jax.random.PRNGKey(0)
    k_x, k_w, k_b = jax.random.split(key, 3)

    B, F = 10, 32                       # batch (exercises batch padding), in_features
    num_species_each_genus = [4, 3, 5]  # exercises species/genus lane padding
    S = sum(num_species_each_genus)     # num_species = 12
    G = len(num_species_each_genus)     # num_genus   = 3

    x = jax.random.normal(k_x, (B, F), dtype=jnp.float32)
    # Deterministic synthetic Linear params (torch.nn.Linear shapes: [S, F], [S]).
    weight = jax.random.normal(k_w, (S, F), dtype=jnp.float32) * 0.1
    bias = jax.random.normal(k_b, (S,), dtype=jnp.float32) * 0.1

    # Exact f32 path: tight tolerance against the f32 reference.
    for mode in ("probs", "logits"):
        g_out, s_out = hierarchical_prediction_head(
            x, weight, bias, num_species_each_genus, output_types=mode,
            matmul_dtype=jnp.float32, out_dtype=jnp.float32)
        jax.block_until_ready((g_out, s_out))
        ref_g, ref_s = _reference(x, weight, bias, num_species_each_genus, mode)
        assert g_out.shape == (B, G) and s_out.shape == (B, S)
        assert jnp.allclose(g_out, ref_g, atol=1e-5, rtol=1e-5), f"{mode} genus f32"
        assert jnp.allclose(s_out, ref_s, atol=1e-5, rtol=1e-5), f"{mode} species f32"

    # Default fast path (bf16 MXU operands, f32 accumulation): mixed-precision tolerance.
    for mode in ("probs", "logits"):
        g_out, s_out = hierarchical_prediction_head(
            x, weight, bias, num_species_each_genus, output_types=mode)
        jax.block_until_ready((g_out, s_out))
        ref_g, ref_s = _reference(x, weight, bias, num_species_each_genus, mode)
        assert g_out.shape == (B, G) and s_out.shape == (B, S)
        assert jnp.allclose(g_out, ref_g, atol=5e-2, rtol=5e-2), f"{mode} genus bf16"
        assert jnp.allclose(s_out, ref_s, atol=5e-2, rtol=5e-2), f"{mode} species bf16"

    print("KERNEL_OK")
</pallas_src>

<mosaic_0001>
module attributes {stable_mosaic.version = 11 : i64} {
  func.func @_head_kernel(%arg0: i32, %arg1: memref<16x32xf32, #tpu.memory_space<vmem>>, %arg2: memref<32x128xf32, #tpu.memory_space<vmem>>, %arg3: memref<1x128xf32, #tpu.memory_space<vmem>>, %arg4: memref<128x128xf32, #tpu.memory_space<vmem>>, %arg5: memref<16x128xf32, #tpu.memory_space<vmem>>, %arg6: memref<16x128xf32, #tpu.memory_space<vmem>>) attributes {dimension_semantics = [#tpu.dimension_semantics<parallel>], iteration_bounds = array<i64: 1>, scalar_prefetch = 0 : i64, scratch_operands = 0 : i64, tpu.core_type = #tpu.core_type<tc>, window_params = [{transform_indices = @transform_0, window_bounds = array<i64: 16, 32>}, {pipeline_mode = #tpu.pipeline_mode<synchronous>, transform_indices = @transform_1, window_bounds = array<i64: 32, 128>}, {pipeline_mode = #tpu.pipeline_mode<synchronous>, transform_indices = @transform_2, window_bounds = array<i64: 1, 128>}, {pipeline_mode = #tpu.pipeline_mode<synchronous>, transform_indices = @transform_3, window_bounds = array<i64: 128, 128>}, {transform_indices = @transform_4, window_bounds = array<i64: 16, 128>}, {transform_indices = @transform_5, window_bounds = array<i64: 16, 128>}]} {
    %c0 = arith.constant 0 : index
    %c0_0 = arith.constant 0 : index
    %0 = vector.load %arg1[%c0, %c0_0] : memref<16x32xf32, #tpu.memory_space<vmem>>, vector<16x32xf32>
    %c0_1 = arith.constant 0 : index
    %c0_2 = arith.constant 0 : index
    %1 = vector.load %arg2[%c0_1, %c0_2] : memref<32x128xf32, #tpu.memory_space<vmem>>, vector<32x128xf32>
    %cst = arith.constant dense<0.000000e+00> : vector<16x128xf32>
    %2 = tpu.matmul %0, %1, %cst {dimension_numbers = #tpu.dot_dimension_numbers<[1], [0], [0], [1], [0, 0, 1, 1], [], []>} : vector<16x32xf32>, vector<32x128xf32>, vector<16x128xf32> -> vector<16x128xf32>
    %c0_3 = arith.constant 0 : index
    %c0_4 = arith.constant 0 : index
    %3 = vector.load %arg3[%c0_3, %c0_4] : memref<1x128xf32, #tpu.memory_space<vmem>>, vector<1x128xf32>
    %4 = vector.broadcast %3 : vector<1x128xf32> to vector<16x128xf32>
    %5 = arith.addf %2, %4 : vector<16x128xf32>
    %cst_5 = arith.constant dense<0xFF800000> : vector<16xf32>
    %6 = vector.multi_reduction <maximumf>, %5, %cst_5 [1] : vector<16x128xf32> to vector<16xf32>
    %7 = vector.shape_cast %6 : vector<16xf32> to vector<16x1xf32>
    %8 = vector.broadcast %7 : vector<16x1xf32> to vector<16x128xf32>
    %9 = arith.subf %5, %8 : vector<16x128xf32>
    %10 = math.exp %9 : vector<16x128xf32>
    %cst_6 = arith.constant dense<0.000000e+00> : vector<16xf32>
    %11 = vector.multi_reduction <add>, %10, %cst_6 [1] : vector<16x128xf32> to vector<16xf32>
    %12 = vector.shape_cast %11 : vector<16xf32> to vector<16x1xf32>
    %c0_7 = arith.constant 0 : index
    %c0_8 = arith.constant 0 : index
    %13 = vector.load %arg4[%c0_7, %c0_8] : memref<128x128xf32, #tpu.memory_space<vmem>>, vector<128x128xf32>
    %cst_9 = arith.constant dense<0.000000e+00> : vector<16x128xf32>
    %14 = tpu.matmul %10, %13, %cst_9 {dimension_numbers = #tpu.dot_dimension_numbers<[1], [0], [0], [1], [0, 0, 1, 1], [], []>} : vector<16x128xf32>, vector<128x128xf32>, vector<16x128xf32> -> vector<16x128xf32>
    %15 = tpu.reciprocal %12 : vector<16x1xf32> -> vector<16x1xf32>
    %16 = vector.broadcast %15 : vector<16x1xf32> to vector<16x128xf32>
    %17 = arith.mulf %14, %16 : vector<16x128xf32>
    %c0_10 = arith.constant 0 : index
    %c0_11 = arith.constant 0 : index
    %18 = vector.load %arg5[%c0_10, %c0_11] : memref<16x128xf32, #tpu.memory_space<vmem>>, vector<16x128xf32>
    tpu.vector_store %arg5[%c0_10, %c0_11], %17 {strides = array<i32>} : memref<16x128xf32, #tpu.memory_space<vmem>>, vector<16x128xf32>,
    %19 = vector.broadcast %15 : vector<16x1xf32> to vector<16x128xf32>
    %20 = arith.mulf %10, %19 : vector<16x128xf32>
    %c0_12 = arith.constant 0 : index
    %c0_13 = arith.constant 0 : index
    %21 = vector.load %arg6[%c0_12, %c0_13] : memref<16x128xf32, #tpu.memory_space<vmem>>, vector<16x128xf32>
    tpu.vector_store %arg6[%c0_12, %c0_13], %20 {strides = array<i32>} : memref<16x128xf32, #tpu.memory_space<vmem>>, vector<16x128xf32>,
    return
  }
  func.func @transform_0(%arg0: i32) -> (i32, i32) {
    %c0_i32 = arith.constant 0 : i32
    %c0_i32_0 = arith.constant 0 : i32
    return %arg0, %c0_i32 : i32, i32
  }
  func.func @transform_1(%arg0: i32) -> (i32, i32) {
    %c0_i32 = arith.constant 0 : i32
    %c0_i32_0 = arith.constant 0 : i32
    %c0_i32_1 = arith.constant 0 : i32
    return %c0_i32, %c0_i32_0 : i32, i32
  }
  func.func @transform_2(%arg0: i32) -> (i32, i32) {
    %c0_i32 = arith.constant 0 : i32
    %c0_i32_0 = arith.constant 0 : i32
    %c0_i32_1 = arith.constant 0 : i32
    return %c0_i32, %c0_i32_0 : i32, i32
  }
  func.func @transform_3(%arg0: i32) -> (i32, i32) {
    %c0_i32 = arith.constant 0 : i32
    %c0_i32_0 = arith.constant 0 : i32
    %c0_i32_1 = arith.constant 0 : i32
    return %c0_i32, %c0_i32_0 : i32, i32
  }
  func.func @transform_4(%arg0: i32) -> (i32, i32) {
    %c0_i32 = arith.constant 0 : i32
    %c0_i32_0 = arith.constant 0 : i32
    return %arg0, %c0_i32 : i32, i32
  }
  func.func @transform_5(%arg0: i32) -> (i32, i32) {
    %c0_i32 = arith.constant 0 : i32
    %c0_i32_0 = arith.constant 0 : i32
    return %arg0, %c0_i32 : i32, i32
  }
}

</mosaic_0001>

<bundles_post_ra>
// kernel: tpu_custom_call.1
= control target key start
LH: loop header
LB: loop body
LE: loop exit
PB: predicated region body
PF: predicated region fallthrough
CT: control target
= control target key end

     0   :  { %11 = vsyncpa [#allocation3], 0  ;;  %s467_s0 = inlined_call_operand.hbm [shape: f32[16,32], index: 0, kind: input, shape index: {}]   ;;  %s468_s1 = inlined_call_operand.hbm [shape: f32[32,128], index: 1, kind: input, shape index: {}]   ;;  %s469_s2 = inlined_call_operand.vmem [shape: f32[1,128], index: 2, kind: input, shape index: {}]   ;;  %s470_s3 = inlined_call_operand.hbm [shape: f32[128,128], index: 3, kind: input, shape index: {}]   ;;  %s471_s4 = inlined_call_operand.hbm [shape: f32[16,128], index: 4, kind: output, shape index: {0}]   ;;  %s472_s5 = inlined_call_operand.hbm [shape: f32[16,128], index: 5, kind: output, shape index: {1}]  }
   0x1   :  { %12 = vsyncpa [#allocation6], 0 }
   0x2   :  { %13 = vsyncpa [#allocation4], 0 }
   0x3   :  { %14 = vsyncpa [#allocation10], 0  ;;  %s32_s20 = sshll.u32 %s468_s1, 4  ;;  %s397_s21 = smov [#allocation5]   ;;  %s33_s20 = int_to_ptr.hbm [resolvable:$true] %s32_s20 }
   0x4   :  { %s34_s22 = sshll.u32 %s397_s21, 4  ;;  %s19_s25 = sshll.u32 %s467_s0, 4  ;;  %s35_s22 = int_to_ptr.vmem [resolvable:$true] %s34_s22  ;;  %s20_s25 = int_to_ptr.hbm [resolvable:$true] %s19_s25 }
   0x5   :  { %s398_s26 = smov 128   ;;  %s399_s27 = smov 8  }
   0x6   :  { %40 = dma.hbm_to_vmem [thread:$0]  %s33_s20, 512, %s35_s22, [#allocation6], %s398_s26, %s398_s26, %s399_s27  }
   0x7   :  { %s400_s28 = smov [#allocation2]   ;;  %s47_s1 = sshll.u32 %s470_s3, 4  ;;  %s48_s1 = int_to_ptr.hbm [resolvable:$true] %s47_s1 }
   0x8   :  { %s21_s29 = sshll.u32 %s400_s28, 4  ;;  %s401_s0 = smov [#allocation7]   ;;  %s22_s29 = int_to_ptr.vmem [resolvable:$true] %s21_s29 }
   0x9   :  { %27 = dma.hbm_to_vmem [thread:$0]  %s20_s25, 256, %s22_s29, [#allocation3], %s398_s26, %s398_s26, %s399_s27  }
   0xa   :  { %s49_s7 = sshll.u32 %s401_s0, 4  ;;  %s50_s7 = int_to_ptr.vmem [resolvable:$true] %s49_s7 }
   0xb   :  { %55 = dma.hbm_to_vmem [thread:$0]  %s48_s1, 2048, %s50_s7, [#allocation6], %s398_s26, %s398_s26, %s399_s27  }
   0xc   :  { %389 = dma.done.wait [#allocation3], 256  }
   0xd   :  { %390 = vsyncadd [#allocation3], 4294967040 }
   0xe   :  { %391 = dma.done.wait [#allocation6], 2560  }
   0xf   :  { %392 = vsyncadd [#allocation6], 4294964736  ;;  %v73_v0 = vld [vmem:[#allocation5 + $0x18] sm:$0xff]  ;;  %v72_v1 = vld [vmem:[#allocation5 + $0x10] sm:$0xff]  ;;  %vm78_vm0 = vcmask 261120   ;;  %s203_s12 = sshll.u32 %s471_s4, 4  ;;  %s204_s12 = int_to_ptr.hbm [resolvable:$true] %s203_s12 }
  0x10   :  { %97 = vmatpush.msra.mxu0 %v73_v0  ;;  %v71_v2 = vld [vmem:[#allocation5 + $0x8] sm:$0xff]  ;;  %v70_v3 = vld [vmem:[#allocation5] sm:$0xff]  ;;  %v68_v4 = vld [vmem:[#allocation2] sm:$0xff]  ;;  %s403_s13 = smov [#allocation9]   ;;  %s216_s17 = sshll.u32 %s472_s5, 4  ;;  %s217_s17 = int_to_ptr.hbm [resolvable:$true] %s216_s17 }
  0x11   :  { %v69_v5 = vld [vmem:[#allocation2 + $0x8] sm:$0xff]  ;;  %v136_v7 = vld [vmem:[#allocation7 + $0x70] sm:$0xff]  ;;  %v135_v8 = vld [vmem:[#allocation7 + $0x68] sm:$0xff]  ;;  %s214_s14 = sshll.u32 %s403_s13, 4  ;;  %s215_s14 = int_to_ptr.vmem [resolvable:$true] %s214_s14 }
  0x12   :  { %98 = vmatpush.msra.mxu0 %v72_v1  ;;  %v137_v6 = vld [vmem:[#allocation7 + $0x78] sm:$0xff]  ;;  %v134_v9 = vld [vmem:[#allocation7 + $0x60] sm:$0xff]  ;;  %v132_v11 = vld [vmem:[#allocation7 + $0x50] sm:$0xff] }
  0x13   :  { %237 = vmatpush.msra.mxu2 %v137_v6  ;;  %138 = vmatpush.msra.mxu1 %v137_v6  ;;  %v133_v10 = vld [vmem:[#allocation7 + $0x58] sm:$0xff]  ;;  %v131_v12 = vld [vmem:[#allocation7 + $0x48] sm:$0xff]  ;;  %v130_v13 = vld [vmem:[#allocation7 + $0x40] sm:$0xff] }
  0x14   :  { %99 = vmatpush.msra.mxu0 %v71_v2  ;;  %v129_v15 = vld [vmem:[#allocation7 + $0x38] sm:$0xff]  ;;  %v128_v16 = vld [vmem:[#allocation7 + $0x30] sm:$0xff]  ;;  %v127_v21 = vld [vmem:[#allocation7 + $0x28] sm:$0xff] }
  0x15   :  { %238 = vmatpush.msra.mxu2 %v136_v7  ;;  %139 = vmatpush.msra.mxu1 %v136_v7  ;;  %v260_v17 = vld [vmem:[%s469_s2] ss:$0 sm:$0xff]  ;;  %v126_v22 = vld [vmem:[#allocation7 + $0x20] sm:$0xff]  ;;  %v125_v23 = vld [vmem:[#allocation7 + $0x18] sm:$0xff]  ;;  %s402_s2 = smov [#allocation8]  }
  0x16   :  { %100 = vmatpush.msra.mxu0 %v70_v3  ;;  %v124_v24 = vld [vmem:[#allocation7 + $0x10] sm:$0xff]  ;;  %v123_v25 = vld [vmem:[#allocation7 + $0x8] sm:$0xff]  ;;  %v122_v26 = vld [vmem:[#allocation7] sm:$0xff]  ;;  %s201_s9 = sshll.u32 %s402_s2, 4  ;;  %s202_s9 = int_to_ptr.vmem [resolvable:$true] %s201_s9 }
  0x17   :  { %235 = vmatmul.msk.f32.vlgmr.msra.gmra.mxu0 %vm78_vm0, %v68_v4  ;;  %239 = vmatpush.msra.mxu2 %v135_v8 }
  0x18   :  { %140 = vmatpush.msra.mxu1 %v135_v8 }
  0x19   :  { %240 = vmatpush.msra.mxu2 %v134_v9 }
  0x1a   :  { %141 = vmatpush.msra.mxu1 %v134_v9 }
  0x1b   :  { %241 = vmatpush.msra.mxu2 %v133_v10 }
  0x1c   :  { %142 = vmatpush.msra.mxu1 %v133_v10 }
  0x1d   :  { %242 = vmatpush.msra.mxu2 %v132_v11 }
  0x1e   :  { %143 = vmatpush.msra.mxu1 %v132_v11 }
  0x1f   :  { %236 = vmatmul.msk.f32.gmra.mxu0 %vm78_vm0, %v69_v5  ;;  %243 = vmatpush.msra.mxu2 %v131_v12 }
  0x20   :  { %144 = vmatpush.msra.mxu1 %v131_v12 }
  0x21   :  { %244 = vmatpush.msra.mxu2 %v130_v13 }
  0x22   :  { %145 = vmatpush.msra.mxu1 %v130_v13 }
  0x23   :  { %245 = vmatpush.msra.mxu2 %v129_v15 }
  0x24   :  { %146 = vmatpush.msra.mxu1 %v129_v15 }
  0x25   :  { %246 = vmatpush.msra.mxu2 %v128_v16 }
  0x26   :  { %147 = vmatpush.msra.mxu1 %v128_v16 }
  0x27   :  { %247 = vmatpush.msra.mxu2 %v127_v21 }
  0x28   :  { %148 = vmatpush.msra.mxu1 %v127_v21 }
  0x29   :  { %248 = vmatpush.msra.mxu2 %v126_v22 }
  0x2a   :  { %149 = vmatpush.msra.mxu1 %v126_v22 }
  0x2b   :  { %249 = vmatpush.msra.mxu2 %v125_v23 }
  0x2c   :  { %150 = vmatpush.msra.mxu1 %v125_v23 }
  0x2d   :  { %250 = vmatpush.msra.mxu2 %v124_v24 }
  0x2e   :  { %151 = vmatpush.msra.mxu1 %v124_v24 }
  0x2f   :  { %251 = vmatpush.msra.mxu2 %v123_v25 }
  0x30   :  { %152 = vmatpush.msra.mxu1 %v123_v25 }
  0x31   :  { %252 = vmatpush.msra.mxu2 %v122_v26 }
  0x32   :  { %153 = vmatpush.msra.mxu1 %v122_v26 }
  0x94   :  { %v102_v14 = vpop.f32.mrf.mxu0 }
  0x95   :  { %v103_v20 = vadd.f32 %v260_v17, %v102_v14 }
  0x9c   :  { %v105_v18 = vpop.f32.mrf.mxu0 }
  0x9d   :  { %v106_v19 = vadd.f32 %v260_v17, %v105_v18 }
  0x9f   :  { %110 = vmax.xlane.f32.xlu0 %v106_v19 }
  0xa7   :  { %108 = vmax.xlane.f32.xlu0 %v103_v20 }
 0x112   :  { %v111_v27 = vpop.xlane.xlu0 %110 }
 0x113   :  { %v113_v28 = vsub.f32 %v106_v19, %v111_v27 }
 0x115   :  { %v116_v29 = vmul.f32 1.442695, %v113_v28 }
 0x117   :  { %261 = vpow2.f32 %v116_v29 }
 0x11a   :  { %v109_v30 = vpop.xlane.xlu0 %108 }
 0x11b   :  { %v112_v31 = vsub.f32 %v103_v20, %v109_v30 }
 0x11d   :  { %v262_v32 = vpop.eup %261  ;;  %v114_v33 = vmul.f32 1.442695, %v112_v31 }
 0x11e   :  { %157 = vmatmul.f32.vlgmr.msra.gmra.mxu2 %v262_v32 }
 0x11f   :  { %263 = vpow2.f32 %v114_v33 }
 0x125   :  { %v264_v34 = vpop.eup %263 }
 0x126   :  { %118 = vadd.xlane.f32.xlu1 %v264_v34  ;;  %154 = vmatmul.f32.vlgmr.msra.gmra.mxu1 %v264_v34 }
 0x12e   :  { %120 = vadd.xlane.f32.xlu1 %v262_v32 }
 0x199   :  { %v119_v35 = vpop.xlane.xlu1 %118 }
 0x19a   :  { %265 = vrcp.f32 %v119_v35  ;;  %v172_v40 = vand.u32 2147483648, %v119_v35  ;;  %v170_v42 = vand.u32 2147483647, %v119_v35  ;;  %vm166_vm2 = vweird.f32 %v119_v35 }
 0x19c   :  { %v173_v45 = vor.u32 1.1754944e-38, %v172_v40  ;;  %vm171_vm4 = vcmp.eq.f32.partialorder %v170_v42, 8.507059e+37 }
 0x1a0   :  { %v266_v36 = vpop.eup %265 }
 0x1a1   :  { %v162_v37 = vmul.f32 %v266_v36, %v119_v35  ;;  %v121_v38 = vpop.xlane.xlu1 %120  ;;  %vm167_vm1 = vweird.f32 %v266_v36  ;;  %v158_v59 = vpop.f32.mrf.mxu2 }
 0x1a2   :  { %267 = vrcp.f32 %v121_v38  ;;  %vm168_vm3 = vmor %vm166_vm2, %vm167_vm1  ;;  %v186_v53 = vand.u32 2147483648, %v121_v38  ;;  %v184_v55 = vand.u32 2147483647, %v121_v38  ;;  %vm180_vm6 = vweird.f32 %v121_v38 }
 0x1a3   :  { %v163_v39 = vsub.f32 1.0, %v162_v37  ;;  %v155_v48 = vpop.f32.mrf.mxu1 }
 0x1a4   :  { %v187_v57 = vor.u32 1.1754944e-38, %v186_v53  ;;  %vm185_vm8 = vcmp.eq.f32.partialorder %v184_v55, 8.507059e+37 }
 0x1a5   :  { %v164_v41 = vmul.f32 %v266_v36, %v163_v39 }
 0x1a7   :  { %v165_v43 = vadd.f32 %v266_v36, %v164_v41 }
 0x1a8   :  { %v268_v44 = vpop.eup %267 }
 0x1a9   :  { %v176_v46 = vmul.f32 %v268_v44, %v121_v38  ;;  %v169_v47 = vsel %vm168_vm3, %v266_v36, %v165_v43  ;;  %vm181_vm5 = vweird.f32 %v268_v44 }
 0x1aa   :  { %v174_v49 = vsel %vm171_vm4, %v173_v45, %v169_v47  ;;  %vm182_vm7 = vmor %vm180_vm6, %vm181_vm5 }
 0x1ab   :  { %v177_v50 = vsub.f32 1.0, %v176_v46  ;;  %v189_v51 = vmul.f32 %v174_v49, %v155_v48  ;;  %v193_v52 = vmul.f32 %v264_v34, %v174_v49 }
 0x1ad   :  { %v178_v54 = vmul.f32 %v268_v44, %v177_v50  ;;  %191 = vst [vmem:[#allocation8] sm:$0xff] %v189_v51 }
 0x1ae   :  { %195 = vst [vmem:[#allocation9] sm:$0xff] %v193_v52 }
 0x1af   :  { %v179_v56 = vadd.f32 %v268_v44, %v178_v54 }
 0x1b1   :  { %v183_v58 = vsel %vm182_vm7, %v268_v44, %v179_v56 }
 0x1b2   :  { %v188_v60 = vsel %vm185_vm8, %v187_v57, %v183_v58 }
 0x1b3   :  { %v190_v61 = vmul.f32 %v188_v60, %v158_v59  ;;  %v194_v62 = vmul.f32 %v262_v32, %v188_v60 }
 0x1b5   :  { %192 = vst [vmem:[#allocation8 + $0x8] sm:$0xff] %v190_v61 }
 0x1b6   :  { %209 = dma.vmem_to_hbm [thread:$0]  %s202_s9, 256, %s204_s12, [#allocation4], %s398_s26, %s398_s26, %s399_s27   ;;  %196 = vst [vmem:[#allocation9 + $0x8] sm:$0xff] %v194_v62 }
 0x1b7   :  { %222 = dma.vmem_to_hbm [thread:$0]  %s215_s14, 256, %s217_s17, [#allocation10], %s398_s26, %s398_s26, %s399_s27  }
 0x1b8   :  { %393 = dma.done.wait [#allocation4], 256  }
 0x1b9   :  { %394 = vsyncadd [#allocation4], 4294967040 }
 0x1ba   :  { %395 = dma.done.wait [#allocation10], 256  }
 0x1bb   :  { %396 = vsyncadd [#allocation10], 4294967040 }
 0x1bc   :  { %231 = vsyncpa [#allocation3], 1 }
 0x1bd   :  { %232 = vsyncpa [#allocation6], 1 }
 0x1be   :  { %233 = vsyncpa [#allocation4], 1 }
 0x1bf   :  { %234 = vsyncpa [#allocation10], 1 }

</bundles_post_ra>
